<compile_context>
chip_gen: v7x
topology: tpu7x:2x2x1
jax: 0.10.0
libtpu: 0.0.40
codegen_flags: <defaults>
</compile_context>

<pallas_src>
import jax
import jax.numpy as jnp
from jax.experimental import pallas as pl
from jax.experimental.pallas import tpu as pltpu


LANE = 128
SUBLANE = 8


def _round_up(x, m):
    return (x + m - 1) // m * m


def _vmem_budget_bytes():
    """Usable VMEM budget (75% of physical), conservative v7x default."""
    cap = 64 * 1024 * 1024  # v7x has 64 MiB per TensorCore; v5e/v6e have 128 MiB
    try:
        info = pltpu.get_tpu_info()
        cap = int(getattr(info, "vmem_capacity_bytes", cap))
    except Exception:
        pass
    return (cap * 3) // 4


def _choose_tiles(B, C, HW, itemsize, x_budget_bytes):
    """Pick (batch_tile, spatial_tile) from the *padded* VMEM footprint.

    One (bt, st, C) f32 block really occupies
        bt * round_up(st, 8) * round_up(C, 128) * itemsize
    bytes in VMEM (lane/sublane layout padding).
    """
    c_pad = _round_up(C, LANE)

    def tile_bytes(bt_, st_):
        return bt_ * _round_up(st_, SUBLANE) * c_pad * itemsize

    bt = min(_round_up(B, SUBLANE), 128)
    if B >= 16:
        # Keep >=2 batch steps so v7x's two TensorCores both get work
        # (the "arbitrary" spatial reduction axis cannot be core-sharded).
        bt = min(bt, _round_up(pl.cdiv(B, 2), SUBLANE))

    st = HW
    # Shrink the batch tile first (stays a multiple of 8 sublanes).
    while bt > SUBLANE and tile_bytes(bt, st) > x_budget_bytes:
        bt -= SUBLANE
    # Then split the spatial axis into multiple-of-8 tiles (the wrapper
    # zero-pads HW up to a multiple of st; zeros are exact under sum).
    if tile_bytes(bt, st) > x_budget_bytes:
        st = max(SUBLANE,
                 (x_budget_bytes // (bt * c_pad * itemsize)) // SUBLANE * SUBLANE)
    return bt, st


def mlp_head_kernel(x_ref, w_ref, b_ref, o_ref, acc_ref):
    # x_ref: (bt, st, C) f32       w_ref: (C, Npad) bf16   b_ref: (1, Npad) f32
    # o_ref: (bt, Npad) out dtype  acc_ref: VMEM (bt, C) f32 running spatial sum
    s = pl.program_id(1)

    @pl.when(s == 0)
    def _():
        acc_ref[...] = jnp.zeros_like(acc_ref)

    # Partial global-average-pool: accumulate spatial sums in f32.  The spatial
    # axis is the sublane axis -> cheap VPU adds + one 8-way sublane fold.
    # (The 1/(H*W) mean scale is folded into w at init time, so plain
    # sum-accumulation across spatial tiles — including zero padding — is exact.)
    acc_ref[...] += jnp.sum(x_ref[...], axis=1)

    @pl.when(s == pl.num_programs(1) - 1)
    def _():
        # Linear head: logits = pooled @ W_scaled + b.
        # bf16 x bf16 inputs with f32 accumulation = native single-pass MXU path.
        logits = jnp.dot(acc_ref[...].astype(jnp.bfloat16), w_ref[...],
                         preferred_element_type=jnp.float32)
        o_ref[...] = (logits + b_ref[...]).astype(o_ref.dtype)


def mlp_head_init(w, b, H, W):
    """One-time setup: fold the 1/(H*W) mean scale into the head weights and
    zero-pad n_classes to a lane-dense multiple of 128.  NOT per-forward work.

    w: (C, n_classes) head weight (transposed PyTorch nn.Linear layout)
    b: (n_classes,)   head bias
    """
    C, N = w.shape
    n_pad = _round_up(N, LANE)
    w_scaled = w.astype(jnp.float32) / jnp.float32(H * W)
    w_p = (jnp.zeros((C, n_pad), jnp.float32)
           .at[:, :N].set(w_scaled)).astype(jnp.bfloat16)
    b_p = jnp.zeros((1, n_pad), jnp.float32).at[:, :N].set(
        b.astype(jnp.float32)[None, :])
    return w_p, b_p


def mlp_classifier_forward(x_nhwc, w_p, b_p, n_classes):
    """Pooled-feature + linear-head forward of MLP_Classifier.

    x_nhwc: (B, H, W, C) float32 channels-last backbone-tail features
    w_p:    (C, Npad) bf16 scale-folded, padded head weight (from mlp_head_init)
    b_p:    (1, Npad) f32 padded head bias (from mlp_head_init)
    """
    B, H, W, C = x_nhwc.shape
    HW = H * W
    n_pad = w_p.shape[1]

    # Channels-last, streamed at native f32 — no standalone wrapper cast pass.
    x3 = x_nhwc.reshape(B, HW, C)

    vmem_limit = _vmem_budget_bytes()
    c_pad = _round_up(C, LANE)
    itemsize = x3.dtype.itemsize
    # Reserve VMEM for the resident w/b, the accumulator and the (double
    # buffered) output slab; the rest is split between the two x buffers.
    reserve = (c_pad * n_pad * 2          # w (bf16)
               + n_pad * 4                # b
               + 128 * c_pad * 4          # acc (bt <= 128)
               + 2 * 128 * n_pad * 4)     # out, double-buffered
    x_budget = max((vmem_limit - reserve) // 2, 1 << 20)

    bt, st = _choose_tiles(B, C, HW, itemsize, x_budget)

    # Zero-pad the spatial axis up to a multiple of the spatial tile (exact
    # under sum).  No-op in the common case st == HW.
    hw_p = _round_up(HW, st)
    if hw_p != HW:
        x3 = jnp.pad(x3, ((0, 0), (0, hw_p - HW), (0, 0)))

    grid = (pl.cdiv(B, bt), hw_p // st)

    out = pl.pallas_call(
        mlp_head_kernel,
        out_shape=jax.ShapeDtypeStruct((B, n_pad), x_nhwc.dtype),
        grid_spec=pltpu.PrefetchScalarGridSpec(
            num_scalar_prefetch=0,
            grid=grid,
            in_specs=[
                # x: tiled over batch (parallel) and spatial (arbitrary) axes,
                # channels whole and lane-mapped.
                pl.BlockSpec((bt, st, C), lambda i, s: (i, s, 0)),
                # w, b: constant block index -> stay resident in VMEM.
                pl.BlockSpec((C, n_pad), lambda i, s: (0, 0)),
                pl.BlockSpec((1, n_pad), lambda i, s: (0, 0)),
            ],
            out_specs=pl.BlockSpec((bt, n_pad), lambda i, s: (i, 0)),
            scratch_shapes=[pltpu.VMEM((bt, C), jnp.float32)],
        ),
        compiler_params=pltpu.CompilerParams(
            dimension_semantics=("parallel", "arbitrary"),
            vmem_limit_bytes=vmem_limit),
    )(x3, w_p, b_p)
    return out[:, :n_classes]


if __name__ == "__main__":
    # Small shapes consistent with the module: batch=8, channels (in_features)=32,
    # spatial 16x16, n_classes=16.  Backbone-tail features are channels-last.
    B, C, H, W = 8, 32, 16, 16
    n_classes = 16

    key = jax.random.PRNGKey(0)
    kx, kw, kb = jax.random.split(key, 3)

    x = jax.random.normal(kx, (B, H, W, C), dtype=jnp.float32)

    # Deterministic nn.Linear-style init: U(-1/sqrt(in_features), +1/sqrt(in_features)).
    # PyTorch stores weight as (n_classes, in_features); we keep the transposed
    # (in_features, n_classes) layout for the kernel's (B,C)@(C,N) matmul.
    bound = 1.0 / jnp.sqrt(jnp.float32(C))
    w = jax.random.uniform(kw, (C, n_classes), dtype=jnp.float32,
                           minval=-bound, maxval=bound)
    b = jax.random.uniform(kb, (n_classes,), dtype=jnp.float32,
                           minval=-bound, maxval=bound)

    # One-time parameter prep (scale fold + lane padding), then forward.
    w_p, b_p = mlp_head_init(w, b, H, W)
    logits = mlp_classifier_forward(x, w_p, b_p, n_classes)
    logits = jax.block_until_ready(logits)

    # Full-precision reference (x is streamed as f32 now; the only deviation is
    # the bf16 head-matmul inputs, well inside the tolerance below).
    pooled = jnp.mean(x.reshape(B, HW := H * W, C), axis=1)
    ref = pooled @ w + b[None, :]

    assert logits.shape == (B, n_classes)
    assert jnp.allclose(logits, ref, atol=2e-3, rtol=2e-3), (
        float(jnp.max(jnp.abs(logits - ref))))

    print("KERNEL_OK")
</pallas_src>

<mosaic_0001>
module attributes {stable_mosaic.version = 11 : i64} {
  func.func @mlp_head_kernel(%arg0: i32, %arg1: i32, %arg2: memref<8x256x32xf32, #tpu.memory_space<vmem>>, %arg3: memref<32x128xbf16, #tpu.memory_space<vmem>>, %arg4: memref<1x128xf32, #tpu.memory_space<vmem>>, %arg5: memref<8x128xf32, #tpu.memory_space<vmem>>, %arg6: memref<8x32xf32, #tpu.memory_space<vmem>>) attributes {dimension_semantics = [#tpu.dimension_semantics<parallel>, #tpu.dimension_semantics<arbitrary>], iteration_bounds = array<i64: 1, 1>, scalar_prefetch = 0 : i64, scratch_operands = 1 : i64, tpu.core_type = #tpu.core_type<tc>, window_params = [{transform_indices = @transform_0, window_bounds = array<i64: 8, 256, 32>}, {pipeline_mode = #tpu.pipeline_mode<synchronous>, transform_indices = @transform_1, window_bounds = array<i64: 32, 128>}, {pipeline_mode = #tpu.pipeline_mode<synchronous>, transform_indices = @transform_2, window_bounds = array<i64: 1, 128>}, {transform_indices = @transform_3, window_bounds = array<i64: 8, 128>}]} {
    %c0_i32 = arith.constant 0 : i32
    %0 = arith.cmpi eq, %arg1, %c0_i32 : i32
    %1 = arith.extui %0 : i1 to i32
    %c0_i32_0 = arith.constant 0 : i32
    %2 = arith.cmpi ne, %1, %c0_i32_0 : i32
    scf.if %2 {
      %cst_9 = arith.constant 0.000000e+00 : f32
      %11 = vector.broadcast %cst_9 : f32 to vector<8x32xf32>
      %c0_10 = arith.constant 0 : index
      %c0_11 = arith.constant 0 : index
      %12 = vector.load %arg6[%c0_10, %c0_11] : memref<8x32xf32, #tpu.memory_space<vmem>>, vector<8x32xf32>
      tpu.vector_store %arg6[%c0_10, %c0_11], %11 {strides = array<i32>} : memref<8x32xf32, #tpu.memory_space<vmem>>, vector<8x32xf32>,
    } else {
    }
    %c0 = arith.constant 0 : index
    %c0_1 = arith.constant 0 : index
    %3 = vector.load %arg6[%c0, %c0_1] : memref<8x32xf32, #tpu.memory_space<vmem>>, vector<8x32xf32>
    %c0_2 = arith.constant 0 : index
    %c0_3 = arith.constant 0 : index
    %c0_4 = arith.constant 0 : index
    %4 = vector.load %arg2[%c0_2, %c0_3, %c0_4] : memref<8x256x32xf32, #tpu.memory_space<vmem>>, vector<8x256x32xf32>
    %cst = arith.constant dense<0.000000e+00> : vector<8x32xf32>
    %5 = vector.multi_reduction <add>, %4, %cst [1] : vector<8x256x32xf32> to vector<8x32xf32>
    %6 = arith.addf %3, %5 : vector<8x32xf32>
    %c0_5 = arith.constant 0 : index
    %c0_6 = arith.constant 0 : index
    %7 = vector.load %arg6[%c0_5, %c0_6] : memref<8x32xf32, #tpu.memory_space<vmem>>, vector<8x32xf32>
    tpu.vector_store %arg6[%c0_5, %c0_6], %6 {strides = array<i32>} : memref<8x32xf32, #tpu.memory_space<vmem>>, vector<8x32xf32>,
    %c0_i32_7 = arith.constant 0 : i32
    %8 = arith.cmpi eq, %arg1, %c0_i32_7 : i32
    %9 = arith.extui %8 : i1 to i32
    %c0_i32_8 = arith.constant 0 : i32
    %10 = arith.cmpi ne, %9, %c0_i32_8 : i32
    scf.if %10 {
      %c0_9 = arith.constant 0 : index
      %c0_10 = arith.constant 0 : index
      %11 = vector.load %arg6[%c0_9, %c0_10] : memref<8x32xf32, #tpu.memory_space<vmem>>, vector<8x32xf32>
      %12 = arith.truncf %11 : vector<8x32xf32> to vector<8x32xbf16>
      %c0_11 = arith.constant 0 : index
      %c0_12 = arith.constant 0 : index
      %13 = vector.load %arg3[%c0_11, %c0_12] : memref<32x128xbf16, #tpu.memory_space<vmem>>, vector<32x128xbf16>
      %cst_13 = arith.constant dense<0.000000e+00> : vector<8x128xf32>
      %14 = tpu.matmul %12, %13, %cst_13 {dimension_numbers = #tpu.dot_dimension_numbers<[1], [0], [0], [1], [0, 0, 1, 1], [], []>} : vector<8x32xbf16>, vector<32x128xbf16>, vector<8x128xf32> -> vector<8x128xf32>
      %c0_14 = arith.constant 0 : index
      %c0_15 = arith.constant 0 : index
      %15 = vector.load %arg4[%c0_14, %c0_15] : memref<1x128xf32, #tpu.memory_space<vmem>>, vector<1x128xf32>
      %16 = vector.broadcast %15 : vector<1x128xf32> to vector<8x128xf32>
      %17 = arith.addf %14, %16 : vector<8x128xf32>
      %c0_16 = arith.constant 0 : index
      %c0_17 = arith.constant 0 : index
      %18 = vector.load %arg5[%c0_16, %c0_17] : memref<8x128xf32, #tpu.memory_space<vmem>>, vector<8x128xf32>
      tpu.vector_store %arg5[%c0_16, %c0_17], %17 {strides = array<i32>} : memref<8x128xf32, #tpu.memory_space<vmem>>, vector<8x128xf32>,
    } else {
    }
    return
  }
  func.func @transform_0(%arg0: i32, %arg1: i32) -> (i32, i32, i32) {
    %c0_i32 = arith.constant 0 : i32
    %c0_i32_0 = arith.constant 0 : i32
    return %arg0, %arg1, %c0_i32 : i32, i32, i32
  }
  func.func @transform_1(%arg0: i32, %arg1: i32) -> (i32, i32) {
    %c0_i32 = arith.constant 0 : i32
    %c0_i32_0 = arith.constant 0 : i32
    %c0_i32_1 = arith.constant 0 : i32
    return %c0_i32, %c0_i32_0 : i32, i32
  }
  func.func @transform_2(%arg0: i32, %arg1: i32) -> (i32, i32) {
    %c0_i32 = arith.constant 0 : i32
    %c0_i32_0 = arith.constant 0 : i32
    %c0_i32_1 = arith.constant 0 : i32
    return %c0_i32, %c0_i32_0 : i32, i32
  }
  func.func @transform_3(%arg0: i32, %arg1: i32) -> (i32, i32) {
    %c0_i32 = arith.constant 0 : i32
    %c0_i32_0 = arith.constant 0 : i32
    return %arg0, %c0_i32 : i32, i32
  }
}

</mosaic_0001>

<bundles_post_ra>
// kernel: tpu_custom_call.1
= control target key start
LH: loop header
LB: loop body
LE: loop exit
PB: predicated region body
PF: predicated region fallthrough
CT: control target
= control target key end

     0   :  { %8 = vsyncpa [#allocation4], 0  ;;  %vm20_vm0 = vcmask 261120   ;;  %v2252_v2 = vmov 0.0   ;;  %vm988_vm1 = vmmov 0   ;;  %vm840_vm2 = vcmask 1041409   ;;  %s2248_s0 = inlined_call_operand.vmem [shape: f32[8,256,32], index: 0, kind: input, shape index: {}]   ;;  %s2249_s1 = inlined_call_operand.vmem [shape: bf16[32,128], index: 1, kind: input, shape index: {}]   ;;  %s2250_s2 = inlined_call_operand.vmem [shape: f32[1,128], index: 2, kind: input, shape index: {}]   ;;  %s2251_s3 = inlined_call_operand.hbm [shape: f32[8,128], index: 3, kind: output, shape index: {}]  }
   0x1   :  { %v23_v0 = vld [vmem:[%s2248_s0] sm:$0xff]  ;;  %v24_v1 = vld [vmem:[%s2248_s0 + $0x8] sm:$0xff]  ;;  %21 = vst.msk [vmem:[#allocation2] sm:$0xff] %vm20_vm0, %v2252_v2  ;;  %v25_v3 = vld [vmem:[%s2248_s0 + $0x10] sm:$0xff]  ;;  %950 = vmatprep.subr.bf16.mxu0 %v2252_v2  ;;  %vm842_vm3 = vcmask 1042434   ;;  %vm844_vm4 = vcmask 1043459  }
   0x2   :  { %v280_v4 = vsel %vm20_vm0, %v23_v0, 0.0  ;;  %v281_v5 = vsel %vm20_vm0, %v24_v1, 0.0  ;;  %v283_v7 = vsel %vm20_vm0, %v25_v3, 0.0  ;;  %v26_v8 = vld [vmem:[%s2248_s0 + $0x18] sm:$0xff]  ;;  %v27_v11 = vld [vmem:[%s2248_s0 + $0x20] sm:$0xff]  ;;  %v28_v14 = vld [vmem:[%s2248_s0 + $0x28] sm:$0xff] }
   0x3   :  { %v282_v6 = vadd.f32 %v281_v5, %v280_v4  ;;  %v285_v10 = vsel %vm20_vm0, %v26_v8, 0.0  ;;  %v287_v13 = vsel %vm20_vm0, %v27_v11, 0.0  ;;  %v55_v15 = vld [vmem:[%s2248_s0 + $0x100] sm:$0xff]  ;;  %v56_v16 = vld [vmem:[%s2248_s0 + $0x108] sm:$0xff]  ;;  %v57_v19 = vld [vmem:[%s2248_s0 + $0x110] sm:$0xff]  ;;  %v289_v21 = vsel %vm20_vm0, %v28_v14, 0.0 }
   0x4   :  { %v349_v17 = vsel %vm20_vm0, %v55_v15, 0.0  ;;  %v350_v18 = vsel %vm20_vm0, %v56_v16, 0.0  ;;  %v29_v22 = vld [vmem:[%s2248_s0 + $0x30] sm:$0xff]  ;;  %v352_v24 = vsel %vm20_vm0, %v57_v19, 0.0  ;;  %v58_v25 = vld [vmem:[%s2248_s0 + $0x118] sm:$0xff]  ;;  %v59_v31 = vld [vmem:[%s2248_s0 + $0x120] sm:$0xff] }
   0x5   :  { %v284_v9 = vadd.f32 %v283_v7, %v282_v6  ;;  %v351_v23 = vadd.f32 %v350_v18, %v349_v17  ;;  %v291_v27 = vsel %vm20_vm0, %v29_v22, 0.0  ;;  %v30_v28 = vld [vmem:[%s2248_s0 + $0x38] sm:$0xff]  ;;  %v354_v30 = vsel %vm20_vm0, %v58_v25, 0.0  ;;  %v87_v33 = vld [vmem:[%s2248_s0 + $0x200] sm:$0xff]  ;;  %v88_v34 = vld [vmem:[%s2248_s0 + $0x208] sm:$0xff]  ;;  %s989_s8 = smov [#allocation3]  }
   0x6   :  { %v89_v35 = vld [vmem:[%s2248_s0 + $0x210] sm:$0xff]  ;;  %v293_v36 = vsel %vm20_vm0, %v30_v28, 0.0  ;;  %v31_v37 = vld [vmem:[%s2248_s0 + $0x40] sm:$0xff]  ;;  %v90_v38 = vld [vmem:[%s2248_s0 + $0x218] sm:$0xff]  ;;  %v418_v40 = vsel %vm20_vm0, %v87_v33, 0.0  ;;  %v419_v41 = vsel %vm20_vm0, %v88_v34, 0.0 }
   0x7   :  { %v286_v12 = vadd.f32 %v285_v10, %v284_v9  ;;  %v353_v29 = vadd.f32 %v352_v24, %v351_v23  ;;  %v421_v42 = vsel %vm20_vm0, %v89_v35, 0.0  ;;  %v356_v43 = vsel %vm20_vm0, %v59_v31, 0.0  ;;  %v60_v45 = vld [vmem:[%s2248_s0 + $0x128] sm:$0xff]  ;;  %v91_v46 = vld [vmem:[%s2248_s0 + $0x220] sm:$0xff]  ;;  %v61_v56 = vld [vmem:[%s2248_s0 + $0x130] sm:$0xff]  ;;  %s935_s9 = sshll.u32 %s989_s8, 4  ;;  %s936_s9 = int_to_ptr.vmem [resolvable:$true] %s935_s9 }
   0x8   :  { %v420_v44 = vadd.f32 %v419_v41, %v418_v40  ;;  %v423_v48 = vsel %vm20_vm0, %v90_v38, 0.0  ;;  %v295_v49 = vsel %vm20_vm0, %v31_v37, 0.0  ;;  %v32_v51 = vld [vmem:[%s2248_s0 + $0x48] sm:$0xff]  ;;  %v358_v53 = vsel %vm20_vm0, %v60_v45, 0.0  ;;  %v33_v60 = vld [vmem:[%s2248_s0 + $0x50] sm:$0xff]  ;;  %v62_v63 = vld [vmem:[%s2248_s0 + $0x138] sm:$0xff]  ;;  %p968_p1 = scmp.lt.s32.totalorder %s936_s9, %s936_s9 }
   0x9   :  { %v288_v20 = vadd.f32 %v287_v13, %v286_v12  ;;  %v355_v39 = vadd.f32 %v354_v30, %v353_v29  ;;  %v425_v55 = vsel %vm20_vm0, %v91_v46, 0.0  ;;  %v92_v57 = vld [vmem:[%s2248_s0 + $0x228] sm:$0xff]  ;;  %v297_v59 = vsel %vm20_vm0, %v32_v51, 0.0  ;;  %v119_v0 = vld [vmem:[%s2248_s0 + $0x300] sm:$0xff]  ;;  %v93_v4 = vld [vmem:[%s2248_s0 + $0x230] sm:$0xff]  ;;  %s963_s10 = scalar_lea.vmem %s936_s9, 128 }
   0xa   :  { %v422_v50 = vadd.f32 %v421_v42, %v420_v44  ;;  %v360_v1 = vsel %vm20_vm0, %v61_v56, 0.0  ;;  %v427_v3 = vsel %vm20_vm0, %v92_v57, 0.0  ;;  %v120_v5 = vld [vmem:[%s2248_s0 + $0x308] sm:$0xff]  ;;  %v121_v6 = vld [vmem:[%s2248_s0 + $0x310] sm:$0xff]  ;;  %v299_v8 = vsel %vm20_vm0, %v33_v60, 0.0  ;;  %v34_v9 = vld [vmem:[%s2248_s0 + $0x58] sm:$0xff]  ;;  %p964_p0 = scmp.ne.s32.totalorder %s936_s9, %s963_s10  ;;  %p969_p2 = scmp.lt.s32.totalorder %s963_s10, %s963_s10 }
   0xb   :  { %v290_v26 = vadd.f32 %v289_v21, %v288_v20  ;;  %v357_v52 = vadd.f32 %v356_v43, %v355_v39  ;;  %v122_v10 = vld [vmem:[%s2248_s0 + $0x318] sm:$0xff]  ;;  %v487_v13 = vsel %vm20_vm0, %v119_v0, 0.0  ;;  %v362_v14 = vsel %vm20_vm0, %v62_v63, 0.0  ;;  %v63_v18 = vld [vmem:[%s2248_s0 + $0x140] sm:$0xff]  ;;  %v64_v33 = vld [vmem:[%s2248_s0 + $0x148] sm:$0xff] }
   0xc   :  { %v424_v54 = vadd.f32 %v423_v48, %v422_v50  ;;  %v429_v15 = vsel %vm20_vm0, %v93_v4, 0.0  ;;  %v488_v16 = vsel %vm20_vm0, %v120_v5, 0.0  ;;  %v490_v17 = vsel %vm20_vm0, %v121_v6, 0.0  ;;  %v94_v19 = vld [vmem:[%s2248_s0 + $0x238] sm:$0xff]  ;;  %v123_v20 = vld [vmem:[%s2248_s0 + $0x320] sm:$0xff]  ;;  %v125_v35 = vld [vmem:[%s2248_s0 + $0x330] sm:$0xff]  ;;  %p970_p3 = por %p969_p2, %p968_p1 }
   0xd   :  { %v292_v32 = vadd.f32 %v291_v27, %v290_v26  ;;  %v359_v61 = vadd.f32 %v358_v53, %v357_v52  ;;  %v489_v22 = vadd.f32 %v488_v16, %v487_v13  ;;  %v301_v23 = vsel %vm20_vm0, %v34_v9, 0.0  ;;  %v35_v25 = vld [vmem:[%s2248_s0 + $0x60] sm:$0xff]  ;;  %v124_v26 = vld [vmem:[%s2248_s0 + $0x328] sm:$0xff]  ;;  %v37_v39 = vld [vmem:[%s2248_s0 + $0x70] sm:$0xff] }
   0xe   :  { %v426_v62 = vadd.f32 %v425_v55, %v424_v54  ;;  %v492_v24 = vsel %vm20_vm0, %v122_v10, 0.0  ;;  %v364_v30 = vsel %vm20_vm0, %v63_v18, 0.0  ;;  %v431_v31 = vsel %vm20_vm0, %v94_v19, 0.0  ;;  %v95_v34 = vld [vmem:[%s2248_s0 + $0x240] sm:$0xff]  ;;  %v36_v38 = vld [vmem:[%s2248_s0 + $0x68] sm:$0xff]  ;;  %v38_v42 = vld [vmem:[%s2248_s0 + $0x78] sm:$0xff]  ;;  %p971_p4 = pnand %p970_p3, %p964_p0 }
   0xf   :  { %v294_v47 = vadd.f32 %v293_v36, %v292_v32  ;;  %v361_v11 = vadd.f32 %v360_v1, %v359_v61  ;;  %v491_v29 = vadd.f32 %v490_v17, %v489_v22  ;;  %v494_v32 = vsel %vm20_vm0, %v123_v20, 0.0  ;;  %v39_v43 = vld [vmem:[%s2248_s0 + $0x80] sm:$0xff]  ;;  %v126_v44 = vld [vmem:[%s2248_s0 + $0x338] sm:$0xff]  ;;  %v40_v48 = vld [vmem:[%s2248_s0 + $0x88] sm:$0xff] }
  0x10   :  { %v428_v12 = vadd.f32 %v427_v3, %v426_v62  ;;  %v303_v40 = vsel %vm20_vm0, %v35_v25, 0.0  ;;  %v496_v41 = vsel %vm20_vm0, %v124_v26, 0.0  ;;  %v366_v50 = vsel %vm20_vm0, %v64_v33, 0.0  ;;  %v42_v53 = vld [vmem:[%s2248_s0 + $0x98] sm:$0xff]  ;;  %v65_v54 = vld [vmem:[%s2248_s0 + $0x150] sm:$0xff]  ;;  %v96_v55 = vld [vmem:[%s2248_s0 + $0x248] sm:$0xff] }
  0x11   :  { %v296_v58 = vadd.f32 %v295_v49, %v294_v47  ;;  %v363_v27 = vadd.f32 %v362_v14, %v361_v11  ;;  %v493_v37 = vadd.f32 %v492_v24, %v491_v29  ;;  %v41_v49 = vld [vmem:[%s2248_s0 + $0x90] sm:$0xff]  ;;  %v433_v51 = vsel %vm20_vm0, %v95_v34, 0.0  ;;  %v44_v60 = vld [vmem:[%s2248_s0 + $0xa8] sm:$0xff]  ;;  %v46_v3 = vld [vmem:[%s2248_s0 + $0xb8] sm:$0xff] }
  0x12   :  { %v430_v28 = vadd.f32 %v429_v15, %v428_v12  ;;  %v498_v52 = vsel %vm20_vm0, %v125_v35, 0.0  ;;  %v305_v57 = vsel %vm20_vm0, %v36_v38, 0.0  ;;  %v307_v61 = vsel %vm20_vm0, %v37_v39, 0.0  ;;  %v45_v1 = vld [vmem:[%s2248_s0 + $0xb0] sm:$0xff]  ;;  %v127_v4 = vld [vmem:[%s2248_s0 + $0x340] sm:$0xff]  ;;  %v66_v10 = vld [vmem:[%s2248_s0 + $0x158] sm:$0xff] }
  0x13   :  { %v298_v7 = vadd.f32 %v297_v59, %v296_v58  ;;  %v365_v45 = vadd.f32 %v364_v30, %v363_v27  ;;  %v495_v47 = vadd.f32 %v494_v32, %v493_v37  ;;  %v43_v59 = vld [vmem:[%s2248_s0 + $0xa0] sm:$0xff]  ;;  %v1208_v62 = vsel %vm20_vm0, %v38_v42, 0.0  ;;  %v97_v15 = vld [vmem:[%s2248_s0 + $0x250] sm:$0xff]  ;;  %v152_v16 = vld [vmem:[%s2248_s0 + $0x408] sm:$0xff] }
  0x14   :  { %v432_v46 = vadd.f32 %v431_v31, %v430_v28  ;;  %v1211_v63 = vsel %vm20_vm0, %v39_v43, 0.0  ;;  %v500_v0 = vsel %vm20_vm0, %v126_v44, 0.0  ;;  %v1224_v5 = vsel %vm20_vm0, %v40_v48, 0.0  ;;  %v47_v9 = vld [vmem:[%s2248_s0 + $0xc0] sm:$0xff]  ;;  %v153_v17 = vld [vmem:[%s2248_s0 + $0x410] sm:$0xff]  ;;  %v48_v22 = vld [vmem:[%s2248_s0 + $0xc8] sm:$0xff] }
  0x15   :  { %v300_v21 = vadd.f32 %v299_v8, %v298_v7  ;;  %v497_v58 = vadd.f32 %v496_v41, %v495_v47  ;;  %v367_v6 = vadd.f32 %v366_v50, %v365_v45  ;;  %v151_v11 = vld [vmem:[%s2248_s0 + $0x400] sm:$0xff]  ;;  %v1236_v12 = vsel %vm20_vm0, %v41_v49, 0.0  ;;  %v50_v28 = vld [vmem:[%s2248_s0 + $0xd8] sm:$0xff]  ;;  %v128_v29 = vld [vmem:[%s2248_s0 + $0x348] sm:$0xff] }
  0x16   :  { %v434_v7 = vadd.f32 %v433_v51, %v432_v46  ;;  %v368_v13 = vsel %vm20_vm0, %v65_v54, 0.0  ;;  %v435_v14 = vsel %vm20_vm0, %v96_v55, 0.0  ;;  %v1250_v19 = vsel %vm20_vm0, %v42_v53, 0.0  ;;  %v154_v30 = vld [vmem:[%s2248_s0 + $0x418] sm:$0xff]  ;;  %v51_v35 = vld [vmem:[%s2248_s0 + $0xe0] sm:$0xff]  ;;  %v53_v48 = vld [vmem:[%s2248_s0 + $0xf0] sm:$0xff] }
  0x17   :  { %v302_v36 = vadd.f32 %v301_v23, %v300_v21  ;;  %v499_v8 = vadd.f32 %v498_v52, %v497_v58  ;;  %v1253_v20 = vsel %vm20_vm0, %v43_v59, 0.0  ;;  %v49_v23 = vld [vmem:[%s2248_s0 + $0xd0] sm:$0xff]  ;;  %v1262_v24 = vsel %vm20_vm0, %v44_v60, 0.0  ;;  %v67_v41 = vld [vmem:[%s2248_s0 + $0x160] sm:$0xff]  ;;  %v98_v42 = vld [vmem:[%s2248_s0 + $0x258] sm:$0xff] }
  0x18   :  { %v1265_v25 = vsel %vm20_vm0, %v45_v1, 0.0  ;;  %v1268_v26 = vsel %vm20_vm0, %v46_v3, 0.0  ;;  %v502_v27 = vsel %vm20_vm0, %v127_v4, 0.0  ;;  %v1281_v31 = vsel %vm20_vm0, %v47_v9, 0.0  ;;  %v155_v43 = vld [vmem:[%s2248_s0 + $0x420] sm:$0xff]  ;;  %v54_v49 = vld [vmem:[%s2248_s0 + $0xf8] sm:$0xff] }
  0x19   :  { %v304_v56 = vadd.f32 %v303_v40, %v302_v36  ;;  %v501_v21 = vadd.f32 %v500_v0, %v499_v8  ;;  %v369_v32 = vadd.f32 %v368_v13, %v367_v6  ;;  %v436_v33 = vadd.f32 %v435_v14, %v434_v7  ;;  %v52_v36 = vld [vmem:[%s2248_s0 + $0xe8] sm:$0xff]  ;;  %v129_v55 = vld [vmem:[%s2248_s0 + $0x350] sm:$0xff]  ;;  %v70_v0 = vld [vmem:[%s2248_s0 + $0x178] sm:$0xff] }
  0x1a   :  { %v556_v34 = vsel %vm20_vm0, %v151_v11, 0.0  ;;  %v370_v37 = vsel %vm20_vm0, %v66_v10, 0.0  ;;  %v437_v38 = vsel %vm20_vm0, %v97_v15, 0.0  ;;  %v557_v39 = vsel %vm20_vm0, %v152_v16, 0.0  ;;  %v68_v54 = vld [vmem:[%s2248_s0 + $0x168] sm:$0xff]  ;;  %v71_v7 = vld [vmem:[%s2248_s0 + $0x180] sm:$0xff] }
  0x1b   :  { %v306_v18 = vadd.f32 %v305_v57, %v304_v56  ;;  %v559_v40 = vsel %vm20_vm0, %v153_v17, 0.0  ;;  %v1304_v45 = vsel %vm20_vm0, %v48_v22, 0.0  ;;  %v503_v46 = vadd.f32 %v502_v27, %v501_v21  ;;  %v156_v56 = vld [vmem:[%s2248_s0 + $0x428] sm:$0xff]  ;;  %v99_v8 = vld [vmem:[%s2248_s0 + $0x260] sm:$0xff]  ;;  %v157_v9 = vld [vmem:[%s2248_s0 + $0x430] sm:$0xff] }
  0x1c   :  { %v558_v47 = vadd.f32 %v557_v39, %v556_v34  ;;  %v1313_v50 = vsel %vm20_vm0, %v49_v23, 0.0  ;;  %v1316_v51 = vsel %vm20_vm0, %v50_v28, 0.0  ;;  %v504_v52 = vsel %vm20_vm0, %v128_v29, 0.0  ;;  %v72_v15 = vld [vmem:[%s2248_s0 + $0x188] sm:$0xff]  ;;  %v73_v16 = vld [vmem:[%s2248_s0 + $0x190] sm:$0xff]  ;;  %v74_v22 = vld [vmem:[%s2248_s0 + $0x198] sm:$0xff] }
  0x1d   :  { %v308_v44 = vadd.f32 %v307_v61, %v306_v18  ;;  %v561_v53 = vsel %vm20_vm0, %v154_v30, 0.0  ;;  %v1330_v57 = vsel %vm20_vm0, %v51_v35, 0.0  ;;  %v371_v58 = vadd.f32 %v370_v37, %v369_v32  ;;  %v69_v61 = vld [vmem:[%s2248_s0 + $0x170] sm:$0xff]  ;;  %v130_v23 = vld [vmem:[%s2248_s0 + $0x358] sm:$0xff]  ;;  %v76_v34 = vld [vmem:[%s2248_s0 + $0x1a8] sm:$0xff] }
  0x1e   :  { %v438_v59 = vadd.f32 %v437_v38, %v436_v33  ;;  %v560_v60 = vadd.f32 %v559_v40, %v558_v47  ;;  %v1339_v1 = vsel %vm20_vm0, %v52_v36, 0.0  ;;  %v372_v3 = vsel %vm20_vm0, %v67_v41, 0.0  ;;  %v158_v27 = vld [vmem:[%s2248_s0 + $0x438] sm:$0xff]  ;;  %v75_v33 = vld [vmem:[%s2248_s0 + $0x1a0] sm:$0xff]  ;;  %v77_v39 = vld [vmem:[%s2248_s0 + $0x1b0] sm:$0xff] }
  0x1f   :  { %v439_v4 = vsel %vm20_vm0, %v98_v42, 0.0  ;;  %v563_v6 = vsel %vm20_vm0, %v155_v43, 0.0  ;;  %v310_v10 = vadd.f32 %v1208_v62, %v308_v44  ;;  %v1355_v11 = vsel %vm20_vm0, %v53_v48, 0.0  ;;  %v100_v40 = vld [vmem:[%s2248_s0 + $0x268] sm:$0xff]  ;;  %v159_v41 = vld [vmem:[%s2248_s0 + $0x440] sm:$0xff]  ;;  %v78_v47 = vld [vmem:[%s2248_s0 + $0x1b8] sm:$0xff] }
  0x20   :  { %v505_v13 = vadd.f32 %v504_v52, %v503_v46  ;;  %v562_v14 = vadd.f32 %v561_v53, %v560_v60  ;;  %v1364_v17 = vsel %vm20_vm0, %v54_v49, 0.0  ;;  %v374_v18 = vsel %vm20_vm0, %v68_v54, 0.0  ;;  %v79_v48 = vld [vmem:[%s2248_s0 + $0x1c0] sm:$0xff]  ;;  %v80_v54 = vld [vmem:[%s2248_s0 + $0x1c8] sm:$0xff] }
  0x21   :  { %v506_v62 = vsel %vm20_vm0, %v129_v55, 0.0  ;;  %v565_v21 = vsel %vm20_vm0, %v156_v56, 0.0  ;;  %v373_v28 = vadd.f32 %v372_v3, %v371_v58  ;;  %v376_v29 = vsel %vm20_vm0, %v69_v61, 0.0  ;;  %v131_v55 = vld [vmem:[%s2248_s0 + $0x360] sm:$0xff]  ;;  %v160_v56 = vld [vmem:[%s2248_s0 + $0x448] sm:$0xff]  ;;  %v82_v3 = vld [vmem:[%s2248_s0 + $0x1d8] sm:$0xff] }
  0x22   :  { %v440_v30 = vadd.f32 %v439_v4, %v438_v59  ;;  %v564_v32 = vadd.f32 %v563_v6, %v562_v14  ;;  %v1386_v35 = vsel %vm20_vm0, %v70_v0, 0.0  ;;  %v1389_v36 = vsel %vm20_vm0, %v71_v7, 0.0  ;;  %v81_v0 = vld [vmem:[%s2248_s0 + $0x1d0] sm:$0xff] }
  0x23   :  { %v441_v37 = vsel %vm20_vm0, %v99_v8, 0.0  ;;  %v567_v38 = vsel %vm20_vm0, %v157_v9, 0.0  ;;  %v312_v42 = vadd.f32 %v1211_v63, %v310_v10  ;;  %v1404_v43 = vsel %vm20_vm0, %v72_v15, 0.0  ;;  %v83_v9 = vld [vmem:[%s2248_s0 + $0x1e0] sm:$0xff]  ;;  %v101_v10 = vld [vmem:[%s2248_s0 + $0x270] sm:$0xff] }
  0x24   :  { %v507_v44 = vadd.f32 %v506_v62, %v505_v13  ;;  %v566_v46 = vadd.f32 %v565_v21, %v564_v32  ;;  %v1413_v49 = vsel %vm20_vm0, %v73_v16, 0.0  ;;  %v1416_v52 = vsel %vm20_vm0, %v74_v22, 0.0  ;;  %v161_v13 = vld [vmem:[%s2248_s0 + $0x450] sm:$0xff]  ;;  %v84_v62 = vld [vmem:[%s2248_s0 + $0x1e8] sm:$0xff]  ;;  %v162_v32 = vld [vmem:[%s2248_s0 + $0x458] sm:$0xff] }
  0x25   :  { %v508_v63 = vsel %vm20_vm0, %v130_v23, 0.0  ;;  %v569_v53 = vsel %vm20_vm0, %v158_v27, 0.0  ;;  %v375_v58 = vadd.f32 %v374_v18, %v373_v28  ;;  %v1430_v59 = vsel %vm20_vm0, %v75_v33, 0.0  ;;  %v85_v21 = vld [vmem:[%s2248_s0 + $0x1f0] sm:$0xff]  ;;  %v86_v28 = vld [vmem:[%s2248_s0 + $0x1f8] sm:$0xff] }
  0x26   :  { %v442_v60 = vadd.f32 %v441_v37, %v440_v30  ;;  %v568_v61 = vadd.f32 %v567_v38, %v566_v46  ;;  %v1439_v4 = vsel %vm20_vm0, %v76_v34, 0.0  ;;  %v1442_v6 = vsel %vm20_vm0, %v77_v39, 0.0  ;;  %v132_v30 = vld [vmem:[%s2248_s0 + $0x368] sm:$0xff]  ;;  %v102_v39 = vld [vmem:[%s2248_s0 + $0x278] sm:$0xff] }
  0x27   :  { %v443_v7 = vsel %vm20_vm0, %v100_v40, 0.0  ;;  %v571_v8 = vsel %vm20_vm0, %v159_v41, 0.0  ;;  %v314_v14 = vadd.f32 %v1224_v5, %v312_v42  ;;  %v1457_v15 = vsel %vm20_vm0, %v78_v47, 0.0  ;;  %v103_v40 = vld [vmem:[%s2248_s0 + $0x280] sm:$0xff]  ;;  %v104_v46 = vld [vmem:[%s2248_s0 + $0x288] sm:$0xff] }
  0x28   :  { %v509_v16 = vadd.f32 %v508_v63, %v507_v44  ;;  %v570_v18 = vadd.f32 %v569_v53, %v568_v61  ;;  %v1466_v22 = vsel %vm20_vm0, %v79_v48, 0.0  ;;  %v1469_v23 = vsel %vm20_vm0, %v80_v54, 0.0  ;;  %v163_v47 = vld [vmem:[%s2248_s0 + $0x460] sm:$0xff] }
  0x29   :  { %v510_v5 = vsel %vm20_vm0, %v131_v55, 0.0  ;;  %v573_v27 = vsel %vm20_vm0, %v160_v56, 0.0  ;;  %v377_v33 = vadd.f32 %v376_v29, %v375_v58  ;;  %v1483_v34 = vsel %vm20_vm0, %v81_v0, 0.0  ;;  %v183_v48 = vld [vmem:[%s2248_s0 + $0x500] sm:$0xff]  ;;  %v184_v56 = vld [vmem:[%s2248_s0 + $0x508] sm:$0xff] }
  0x2a   :  { %v444_v37 = vadd.f32 %v443_v7, %v442_v60  ;;  %v572_v38 = vadd.f32 %v571_v8, %v570_v18  ;;  %v1492_v41 = vsel %vm20_vm0, %v82_v3, 0.0  ;;  %v1495_v42 = vsel %vm20_vm0, %v83_v9, 0.0  ;;  %v164_v3 = vld [vmem:[%s2248_s0 + $0x468] sm:$0xff]  ;;  %v185_v7 = vld [vmem:[%s2248_s0 + $0x510] sm:$0xff] }
  0x2b   :  { %v445_v29 = vsel %vm20_vm0, %v101_v10, 0.0  ;;  %v575_v44 = vsel %vm20_vm0, %v161_v13, 0.0  ;;  %v316_v63 = vadd.f32 %v1236_v12, %v314_v14  ;;  %v1510_v53 = vsel %vm20_vm0, %v84_v62, 0.0  ;;  %v133_v12 = vld [vmem:[%s2248_s0 + $0x370] sm:$0xff]  ;;  %v186_v14 = vld [vmem:[%s2248_s0 + $0x518] sm:$0xff] }
  0x2c   :  { %v511_v54 = vadd.f32 %v510_v5, %v509_v16  ;;  %v574_v55 = vadd.f32 %v573_v27, %v572_v38  ;;  %v1516_v58 = vsel %vm20_vm0, %v85_v21, 0.0  ;;  %v1519_v60 = vsel %vm20_vm0, %v86_v28, 0.0  ;;  %v106_v5 = vld [vmem:[%s2248_s0 + $0x298] sm:$0xff]  ;;  %v107_v27 = vld [vmem:[%s2248_s0 + $0x2a0] sm:$0xff] }
  0x2d   :  { %2253 = vst [vmem:[#allocation6_spill] sm:$0xff] %v1519_v60  ;;  %v512_v61 = vsel %vm20_vm0, %v132_v30, 0.0  ;;  %v577_v0 = vsel %vm20_vm0, %v162_v32, 0.0  ;;  %v379_v8 = vadd.f32 %v1386_v35, %v377_v33  ;;  %v446_v9 = vadd.f32 %v445_v29, %v444_v37  ;;  %v105_v35 = vld [vmem:[%s2248_s0 + $0x290] sm:$0xff]  ;;  %v187_v38 = vld [vmem:[%s2248_s0 + $0x520] sm:$0xff] }
  0x2e   :  { %v447_v10 = vsel %vm20_vm0, %v102_v39, 0.0  ;;  %v576_v13 = vadd.f32 %v575_v44, %v574_v55  ;;  %v449_v16 = vsel %vm20_vm0, %v103_v40, 0.0  ;;  %v1539_v18 = vsel %vm20_vm0, %v104_v46, 0.0  ;;  %v165_v37 = vld [vmem:[%s2248_s0 + $0x470] sm:$0xff]  ;;  %v134_v46 = vld [vmem:[%s2248_s0 + $0x378] sm:$0xff]  ;;  %v199_v60 = vld [vmem:[%s2248_s0 + $0x580] sm:$0xff] }
  0x2f   :  { %v579_v62 = vsel %vm20_vm0, %v163_v47, 0.0  ;;  %v625_v21 = vsel %vm20_vm0, %v183_v48, 0.0  ;;  %v318_v28 = vadd.f32 %v1250_v19, %v316_v63  ;;  %v513_v30 = vadd.f32 %v512_v61, %v511_v54  ;;  %v108_v19 = vld [vmem:[%s2248_s0 + $0x2a8] sm:$0xff]  ;;  %v109_v55 = vld [vmem:[%s2248_s0 + $0x2b0] sm:$0xff] }
  0x30   :  { %v578_v32 = vadd.f32 %v577_v0, %v576_v13  ;;  %v626_v33 = vsel %vm20_vm0, %v184_v56, 0.0  ;;  %v514_v39 = vsel %vm20_vm0, %v133_v12, 0.0  ;;  %v581_v40 = vsel %vm20_vm0, %v164_v3, 0.0  ;;  %v188_v56 = vld [vmem:[%s2248_s0 + $0x528] sm:$0xff]  ;;  %v110_v3 = vld [vmem:[%s2248_s0 + $0x2b8] sm:$0xff] }
  0x31   :  { %v627_v29 = vadd.f32 %v626_v33, %v625_v21  ;;  %v628_v44 = vsel %vm20_vm0, %v185_v7, 0.0  ;;  %v381_v47 = vadd.f32 %v1389_v36, %v379_v8  ;;  %v448_v48 = vadd.f32 %v447_v10, %v446_v9  ;;  %v111_v7 = vld [vmem:[%s2248_s0 + $0x2c0] sm:$0xff]  ;;  %v189_v21 = vld [vmem:[%s2248_s0 + $0x530] sm:$0xff] }
  0x32   :  { %v580_v63 = vadd.f32 %v579_v62, %v578_v32  ;;  %v630_v54 = vsel %vm20_vm0, %v186_v14, 0.0  ;;  %v1578_v61 = vsel %vm20_vm0, %v105_v35, 0.0  ;;  %v1581_v0 = vsel %vm20_vm0, %v106_v5, 0.0  ;;  %v112_v14 = vld [vmem:[%s2248_s0 + $0x2c8] sm:$0xff]  ;;  %v166_v62 = vld [vmem:[%s2248_s0 + $0x478] sm:$0xff]  ;;  %v113_v32 = vld [vmem:[%s2248_s0 + $0x2d0] sm:$0xff] }
  0x33   :  { %v1584_v36 = vsel %vm20_vm0, %v107_v27, 0.0  ;;  %v629_v12 = vadd.f32 %v628_v44, %v627_v29  ;;  %v515_v8 = vadd.f32 %v514_v39, %v513_v30  ;;  %v583_v10 = vsel %vm20_vm0, %v165_v37, 0.0  ;;  %v135_v33 = vld [vmem:[%s2248_s0 + $0x380] sm:$0xff] }
  0x34   :  { %v582_v9 = vadd.f32 %v581_v40, %v580_v63  ;;  %v632_v13 = vsel %vm20_vm0, %v187_v38, 0.0  ;;  %v320_v35 = vadd.f32 %v1253_v20, %v318_v28  ;;  %v1605_v5 = vsel %vm20_vm0, %v108_v19, 0.0  ;;  %v114_v28 = vld [vmem:[%s2248_s0 + $0x2d8] sm:$0xff]  ;;  %v115_v19 = vld [vmem:[%s2248_s0 + $0x2e0] sm:$0xff] }
  0x35   :  { %v516_v27 = vsel %vm20_vm0, %v134_v46, 0.0  ;;  %v631_v30 = vadd.f32 %v630_v54, %v629_v12  ;;  %v383_v37 = vadd.f32 %v1404_v43, %v381_v47  ;;  %v450_v38 = vadd.f32 %v449_v16, %v448_v48  ;;  %v190_v40 = vld [vmem:[%s2248_s0 + $0x538] sm:$0xff]  ;;  %v116_v46 = vld [vmem:[%s2248_s0 + $0x2e8] sm:$0xff]  ;;  %v191_v12 = vld [vmem:[%s2248_s0 + $0x540] sm:$0xff] }
  0x36   :  { %v1616_v39 = vsel %vm20_vm0, %v109_v55, 0.0  ;;  %v634_v20 = vsel %vm20_vm0, %v188_v56, 0.0  ;;  %v1626_v29 = vsel %vm20_vm0, %v110_v3, 0.0  ;;  %v1629_v44 = vsel %vm20_vm0, %v111_v7, 0.0  ;;  %v117_v55 = vld [vmem:[%s2248_s0 + $0x2f0] sm:$0xff]  ;;  %v167_v56 = vld [vmem:[%s2248_s0 + $0x480] sm:$0xff] }
  0x37   :  { %v584_v43 = vadd.f32 %v583_v10, %v582_v9  ;;  %v633_v16 = vadd.f32 %v632_v13, %v631_v30  ;;  %v1638_v47 = vsel %vm20_vm0, %v112_v14, 0.0  ;;  %v517_v48 = vadd.f32 %v516_v27, %v515_v8  ;;  %v118_v10 = vld [vmem:[%s2248_s0 + $0x2f8] sm:$0xff]  ;;  %v136_v13 = vld [vmem:[%s2248_s0 + $0x388] sm:$0xff] }
  0x38   :  { %v585_v63 = vsel %vm20_vm0, %v166_v62, 0.0  ;;  %v636_v54 = vsel %vm20_vm0, %v189_v21, 0.0  ;;  %v322_v3 = vadd.f32 %v1262_v24, %v320_v35  ;;  %v1653_v7 = vsel %vm20_vm0, %v113_v32, 0.0  ;;  %v137_v35 = vld [vmem:[%s2248_s0 + $0x390] sm:$0xff]  ;;  %v138_v27 = vld [vmem:[%s2248_s0 + $0x398] sm:$0xff]  ;;  %v192_v30 = vld [vmem:[%s2248_s0 + $0x548] sm:$0xff] }
  0x39   :  { %v518_v8 = vsel %vm20_vm0, %v135_v33, 0.0  ;;  %v635_v9 = vadd.f32 %v634_v20, %v633_v16  ;;  %v385_v14 = vadd.f32 %v1413_v49, %v383_v37  ;;  %v452_v62 = vadd.f32 %v1539_v18, %v450_v38  ;;  %v139_v37 = vld [vmem:[%s2248_s0 + $0x3a0] sm:$0xff]  ;;  %v140_v38 = vld [vmem:[%s2248_s0 + $0x3a8] sm:$0xff] }
  0x3a   :  { %v1665_v24 = vsel %vm20_vm0, %v114_v28, 0.0  ;;  %v638_v21 = vsel %vm20_vm0, %v190_v40, 0.0  ;;  %v1678_v49 = vsel %vm20_vm0, %v115_v19, 0.0  ;;  %v1681_v18 = vsel %vm20_vm0, %v116_v46, 0.0  ;;  %v168_v20 = vld [vmem:[%s2248_s0 + $0x488] sm:$0xff]  ;;  %v193_v19 = vld [vmem:[%s2248_s0 + $0x550] sm:$0xff] }
  0x3b   :  { %v586_v32 = vadd.f32 %v585_v63, %v584_v43  ;;  %v637_v33 = vadd.f32 %v636_v54, %v635_v9  ;;  %v1693_v28 = vsel %vm20_vm0, %v117_v55, 0.0  ;;  %v519_v40 = vadd.f32 %v518_v8, %v517_v48  ;;  %v961_v48 = vld [vmem:[%s2249_s1] sm:$0xff]   ;;  %v141_v55 = vld [vmem:[%s2248_s0 + $0x3b0] sm:$0xff]  ;;  %v194_v8 = vld [vmem:[%s2248_s0 + $0x558] sm:$0xff] }
  0x3c   :  { %v587_v16 = vsel %vm20_vm0, %v167_v56, 0.0  ;;  %v640_v43 = vsel %vm20_vm0, %v191_v12, 0.0  ;;  %v324_v46 = vadd.f32 %v1265_v25, %v322_v3  ;;  %v1702_v63 = vsel %vm20_vm0, %v118_v10, 0.0  ;;  %v142_v3 = vld [vmem:[%s2248_s0 + $0x3b8] sm:$0xff]  ;;  %951 = vmatpush3.bf16.msra.mxu0 %v961_v48 }
  0x3d   :  { %2254 = vst [vmem:[#allocation7_spill] sm:$0xff] %v1702_v63  ;;  %v520_v54 = vsel %vm20_vm0, %v136_v13, 0.0  ;;  %v639_v9 = vadd.f32 %v638_v21, %v637_v33  ;;  %v387_v56 = vadd.f32 %v1416_v52, %v385_v14  ;;  %v454_v12 = vadd.f32 %v1578_v61, %v452_v62  ;;  %v169_v52 = vld [vmem:[%s2248_s0 + $0x490] sm:$0xff]  ;;  %v215_v61 = vld [vmem:[%s2248_s0 + $0x600] sm:$0xff]  ;;  %952 = vmatprep.subr.bf16.mxu0 %v2252_v2  ;;  %v170_v63 = vld [vmem:[%s2248_s0 + $0x498] sm:$0xff] }
  0x3e   :  { %v642_v25 = vsel %vm20_vm0, %v192_v30, 0.0  ;;  %v522_v10 = vsel %vm20_vm0, %v137_v35, 0.0  ;;  %v524_v13 = vsel %vm20_vm0, %v138_v27, 0.0  ;;  %v588_v21 = vadd.f32 %v587_v16, %v586_v32  ;;  %v962_v27 = vld [vmem:[%s2249_s1 + $0x8] sm:$0xff]   ;;  %v195_v32 = vld [vmem:[%s2248_s0 + $0x560] sm:$0xff] }
  0x3f   :  { %v641_v33 = vadd.f32 %v640_v43, %v639_v9  ;;  %v521_v14 = vadd.f32 %v520_v54, %v519_v40  ;;  %v1729_v62 = vsel %vm20_vm0, %v139_v37, 0.0  ;;  %v589_v30 = vsel %vm20_vm0, %v168_v20, 0.0  ;;  %v216_v40 = vld [vmem:[%s2248_s0 + $0x608] sm:$0xff]  ;;  %v217_v37 = vld [vmem:[%s2248_s0 + $0x610] sm:$0xff]  ;;  %v143_v54 = vld [vmem:[%s2248_s0 + $0x3c0] sm:$0xff] }
  0x40   :  { %v644_v35 = vsel %vm20_vm0, %v193_v19, 0.0  ;;  %v326_v20 = vadd.f32 %v1268_v26, %v324_v46  ;;  %v1748_v16 = vsel %vm20_vm0, %v140_v38, 0.0  ;;  %v1751_v43 = vsel %vm20_vm0, %v141_v55, 0.0  ;;  %v144_v38 = vld [vmem:[%s2248_s0 + $0x3c8] sm:$0xff]  ;;  %v218_v55 = vld [vmem:[%s2248_s0 + $0x618] sm:$0xff]  ;;  %953 = vmatpush3.bf16.msra.mxu0 %v962_v27 }
  0x41   :  { %v643_v19 = vadd.f32 %v642_v25, %v641_v33  ;;  %v389_v9 = vadd.f32 %v1430_v59, %v387_v56  ;;  %v456_v48 = vadd.f32 %v1581_v0, %v454_v12  ;;  %v1759_v2 = vsel %vm20_vm0, %v142_v3, 0.0  ;;  %v196_v46 = vld [vmem:[%s2248_s0 + $0x568] sm:$0xff]  ;;  %v146_v27 = vld [vmem:[%s2248_s0 + $0x3d8] sm:$0xff] }
  0x42   :  { %v646_v26 = vsel %vm20_vm0, %v194_v8, 0.0  ;;  %v590_v59 = vadd.f32 %v589_v30, %v588_v21  ;;  %v591_v0 = vsel %vm20_vm0, %v169_v52, 0.0  ;;  %v694_v12 = vsel %vm20_vm0, %v215_v61, 0.0  ;;  %v197_v21 = vld [vmem:[%s2248_s0 + $0x570] sm:$0xff]  ;;  %v219_v52 = vld [vmem:[%s2248_s0 + $0x620] sm:$0xff] }
  0x43   :  { %v645_v56 = vadd.f32 %v644_v35, %v643_v19  ;;  %v523_v25 = vadd.f32 %v522_v10, %v521_v14  ;;  %v648_v3 = vsel %vm20_vm0, %v195_v32, 0.0  ;;  %v695_v8 = vsel %vm20_vm0, %v216_v40, 0.0  ;;  %v145_v35 = vld [vmem:[%s2248_s0 + $0x3d0] sm:$0xff]  ;;  %v198_v19 = vld [vmem:[%s2248_s0 + $0x578] sm:$0xff] }
  0x44   :  { %v697_v33 = vsel %vm20_vm0, %v217_v37, 0.0  ;;  %v328_v10 = vadd.f32 %v1281_v31, %v326_v20  ;;  %v1787_v61 = vsel %vm20_vm0, %v143_v54, 0.0  ;;  %v696_v30 = vadd.f32 %v695_v8, %v694_v12  ;;  %v147_v20 = vld [vmem:[%s2248_s0 + $0x3e0] sm:$0xff]  ;;  %v220_v54 = vld [vmem:[%s2248_s0 + $0x628] sm:$0xff] }
  0x45   :  { %v647_v14 = vadd.f32 %v646_v26, %v645_v56  ;;  %v391_v32 = vadd.f32 %v1439_v4, %v389_v9  ;;  %v1797_v40 = vsel %vm20_vm0, %v144_v38, 0.0  ;;  %v650_v31 = vsel %vm20_vm0, %v196_v46, 0.0  ;;  %v171_v8 = vld [vmem:[%s2248_s0 + $0x4a0] sm:$0xff] }
  0x46   :  { %v699_v37 = vsel %vm20_vm0, %v218_v55, 0.0  ;;  %v458_v4 = vadd.f32 %v1584_v36, %v456_v48  ;;  %v592_v9 = vadd.f32 %v591_v0, %v590_v59  ;;  %v698_v38 = vadd.f32 %v697_v33, %v696_v30  ;;  %v221_v36 = vld [vmem:[%s2248_s0 + $0x630] sm:$0xff]  ;;  %v148_v0 = vld [vmem:[%s2248_s0 + $0x3e8] sm:$0xff]  ;;  %v222_v30 = vld [vmem:[%s2248_s0 + $0x638] sm:$0xff] }
  0x47   :  { %v649_v26 = vadd.f32 %v648_v3, %v647_v14  ;;  %v525_v46 = vadd.f32 %v524_v13, %v523_v25  ;;  %v593_v55 = vsel %vm20_vm0, %v170_v63, 0.0  ;;  %v652_v56 = vsel %vm20_vm0, %v197_v21, 0.0  ;;  %v200_v14 = vld [vmem:[%s2248_s0 + $0x588] sm:$0xff] }
  0x48   :  { %v701_v12 = vsel %vm20_vm0, %v219_v52, 0.0  ;;  %v1824_v13 = vsel %vm20_vm0, %v145_v35, 0.0  ;;  %v1827_v63 = vsel %vm20_vm0, %v146_v27, 0.0  ;;  %v700_v59 = vadd.f32 %v699_v37, %v698_v38  ;;  %v149_v52 = vld [vmem:[%s2248_s0 + $0x3f0] sm:$0xff]  ;;  %v150_v38 = vld [vmem:[%s2248_s0 + $0x3f8] sm:$0xff] }
  0x49   :  { %v651_v48 = vadd.f32 %v650_v31, %v649_v26  ;;  %v393_v25 = vadd.f32 %v1442_v6, %v391_v32  ;;  %v1834_v3 = vsel %vm20_vm0, %v147_v20, 0.0  ;;  %v654_v33 = vsel %vm20_vm0, %v198_v19, 0.0  ;;  %v201_v26 = vld [vmem:[%s2248_s0 + $0x590] sm:$0xff] }
  0x4a   :  { %v703_v21 = vsel %vm20_vm0, %v220_v54, 0.0  ;;  %v460_v6 = vadd.f32 %v1605_v5, %v458_v4  ;;  %v594_v35 = vadd.f32 %v593_v55, %v592_v9  ;;  %v702_v32 = vadd.f32 %v701_v12, %v700_v59  ;;  %v172_v54 = vld [vmem:[%s2248_s0 + $0x4a8] sm:$0xff]  ;;  %v223_v5 = vld [vmem:[%s2248_s0 + $0x640] sm:$0xff] }
  0x4b   :  { %v653_v27 = vadd.f32 %v652_v56, %v651_v48  ;;  %v527_v31 = vadd.f32 %v1729_v62, %v525_v46  ;;  %v595_v37 = vsel %vm20_vm0, %v171_v8, 0.0  ;;  %v656_v20 = vsel %vm20_vm0, %v199_v60, 0.0  ;;  %v224_v8 = vld [vmem:[%s2248_s0 + $0x648] sm:$0xff] }
  0x4c   :  { %v705_v19 = vsel %vm20_vm0, %v221_v36, 0.0  ;;  %v330_v62 = vadd.f32 %v1304_v45, %v328_v10  ;;  %v1863_v4 = vsel %vm20_vm0, %v148_v0, 0.0  ;;  %v704_v9 = vadd.f32 %v703_v21, %v702_v32  ;;  %v173_v45 = vld [vmem:[%s2248_s0 + $0x4b0] sm:$0xff]  ;;  %v202_v10 = vld [vmem:[%s2248_s0 + $0x598] sm:$0xff] }
  0x4d   :  { %v655_v60 = vadd.f32 %v654_v33, %v653_v27  ;;  %v395_v46 = vadd.f32 %v1457_v15, %v393_v25  ;;  %v1870_v55 = vsel %vm20_vm0, %v149_v52, 0.0  ;;  %v658_v56 = vsel %vm20_vm0, %v200_v14, 0.0  ;;  %v203_v52 = vld [vmem:[%s2248_s0 + $0x5a0] sm:$0xff]  ;;  %v225_v14 = vld [vmem:[%s2248_s0 + $0x650] sm:$0xff]  ;;  %v248_v27 = vld [vmem:[%s2248_s0 + $0x708] sm:$0xff] }
  0x4e   :  { %v707_v12 = vsel %vm20_vm0, %v222_v30, 0.0  ;;  %v462_v15 = vadd.f32 %v1616_v39, %v460_v6  ;;  %v596_v36 = vadd.f32 %v595_v37, %v594_v35  ;;  %v706_v59 = vadd.f32 %v705_v19, %v704_v9  ;;  %v247_v39 = vld [vmem:[%s2248_s0 + $0x700] sm:$0xff]  ;;  %v249_v32 = vld [vmem:[%s2248_s0 + $0x710] sm:$0xff]  ;;  %v174_v19 = vld [vmem:[%s2248_s0 + $0x4b8] sm:$0xff] }
  0x4f   :  { %v657_v48 = vadd.f32 %v656_v20, %v655_v60  ;;  %v529_v0 = vadd.f32 %v1748_v16, %v527_v31  ;;  %v597_v25 = vsel %vm20_vm0, %v172_v54, 0.0  ;;  %v660_v33 = vsel %vm20_vm0, %v201_v26, 0.0  ;;  %v204_v54 = vld [vmem:[%s2248_s0 + $0x5a8] sm:$0xff]  ;;  %v226_v26 = vld [vmem:[%s2248_s0 + $0x658] sm:$0xff] }
  0x50   :  { %v709_v21 = vsel %vm20_vm0, %v223_v5, 0.0  ;;  %v1898_v16 = vadd.f32 %v1313_v50, %v330_v62  ;;  %v1901_v30 = vsel %vm20_vm0, %v150_v38, 0.0  ;;  %v708_v35 = vadd.f32 %v707_v12, %v706_v59  ;;  %v250_v9 = vld [vmem:[%s2248_s0 + $0x718] sm:$0xff] }
  0x51   :  { %v659_v6 = vadd.f32 %v658_v56, %v657_v48  ;;  %v397_v31 = vadd.f32 %v1466_v22, %v395_v46  ;;  %v599_v37 = vsel %vm20_vm0, %v173_v45, 0.0  ;;  %v662_v50 = vsel %vm20_vm0, %v202_v10, 0.0  ;;  %v205_v45 = vld [vmem:[%s2248_s0 + $0x5b0] sm:$0xff] }
  0x52   :  { %v711_v20 = vsel %vm20_vm0, %v224_v8, 0.0  ;;  %v464_v22 = vadd.f32 %v1626_v29, %v462_v15  ;;  %v598_v5 = vadd.f32 %v597_v25, %v596_v36  ;;  %v710_v60 = vadd.f32 %v709_v21, %v708_v35  ;;  %v227_v29 = vld [vmem:[%s2248_s0 + $0x660] sm:$0xff]  ;;  %v228_v21 = vld [vmem:[%s2248_s0 + $0x668] sm:$0xff] }
  0x53   :  { %v661_v62 = vadd.f32 %v660_v33, %v659_v6  ;;  %v531_v38 = vadd.f32 %v1751_v43, %v529_v0  ;;  %v664_v46 = vsel %vm20_vm0, %v203_v52, 0.0  ;;  %v713_v56 = vsel %vm20_vm0, %v225_v14, 0.0  ;;  %v251_v36 = vld [vmem:[%s2248_s0 + $0x720] sm:$0xff]  ;;  %v206_v33 = vld [vmem:[%s2248_s0 + $0x5b8] sm:$0xff]  ;;  %v252_v35 = vld [vmem:[%s2248_s0 + $0x728] sm:$0xff] }
  0x54   :  { %v763_v12 = vsel %vm20_vm0, %v247_v39, 0.0  ;;  %v712_v8 = vadd.f32 %v711_v20, %v710_v60  ;;  %v764_v15 = vsel %vm20_vm0, %v248_v27, 0.0  ;;  %v766_v43 = vsel %vm20_vm0, %v249_v32, 0.0 }
  0x55   :  { %v663_v10 = vadd.f32 %v662_v50, %v661_v62  ;;  %v601_v48 = vsel %vm20_vm0, %v174_v19, 0.0  ;;  %v666_v59 = vsel %vm20_vm0, %v204_v54, 0.0  ;;  %v715_v0 = vsel %vm20_vm0, %v226_v26, 0.0  ;;  %v175_v19 = vld [vmem:[%s2248_s0 + $0x4c0] sm:$0xff] }
  0x56   :  { %v765_v25 = vadd.f32 %v764_v15, %v763_v12  ;;  %v600_v52 = vadd.f32 %v599_v37, %v598_v5  ;;  %v714_v39 = vadd.f32 %v713_v56, %v712_v8  ;;  %v768_v6 = vsel %vm20_vm0, %v250_v9, 0.0  ;;  %v229_v37 = vld [vmem:[%s2248_s0 + $0x670] sm:$0xff]  ;;  %v230_v56 = vld [vmem:[%s2248_s0 + $0x678] sm:$0xff] }
  0x57   :  { %v665_v14 = vadd.f32 %v664_v46, %v663_v10  ;;  %v533_v27 = vadd.f32 %v1759_v2, %v531_v38  ;;  %v668_v32 = vsel %vm20_vm0, %v205_v45, 0.0  ;;  %v717_v50 = vsel %vm20_vm0, %v227_v29, 0.0  ;;  %v253_v2 = vld [vmem:[%s2248_s0 + $0x730] sm:$0xff]  ;;  %v207_v29 = vld [vmem:[%s2248_s0 + $0x5c0] sm:$0xff] }
  0x58   :  { %v767_v20 = vadd.f32 %v766_v43, %v765_v25  ;;  %v466_v54 = vadd.f32 %v1629_v44, %v464_v22  ;;  %v716_v5 = vadd.f32 %v715_v0, %v714_v39  ;;  %v770_v62 = vsel %vm20_vm0, %v251_v36, 0.0  ;;  %v176_v43 = vld [vmem:[%s2248_s0 + $0x4c8] sm:$0xff]  ;;  %v231_v36 = vld [vmem:[%s2248_s0 + $0x680] sm:$0xff] }
  0x59   :  { %v667_v26 = vadd.f32 %v666_v59, %v665_v14  ;;  %v399_v60 = vadd.f32 %v1469_v23, %v397_v31  ;;  %v670_v9 = vsel %vm20_vm0, %v206_v33, 0.0  ;;  %v719_v38 = vsel %vm20_vm0, %v228_v21, 0.0  ;;  %v254_v23 = vld [vmem:[%s2248_s0 + $0x738] sm:$0xff]  ;;  %v255_v25 = vld [vmem:[%s2248_s0 + $0x740] sm:$0xff]  ;;  %v232_v39 = vld [vmem:[%s2248_s0 + $0x688] sm:$0xff] }
  0x5a   :  { %v769_v46 = vadd.f32 %v768_v6, %v767_v20  ;;  %v602_v44 = vadd.f32 %v601_v48, %v600_v52  ;;  %v718_v12 = vadd.f32 %v717_v50, %v716_v5  ;;  %v772_v45 = vsel %vm20_vm0, %v252_v35, 0.0  ;;  %v208_v35 = vld [vmem:[%s2248_s0 + $0x5c8] sm:$0xff] }
  0x5b   :  { %v669_v22 = vadd.f32 %v668_v32, %v667_v26  ;;  %v535_v31 = vadd.f32 %v1787_v61, %v533_v27  ;;  %v603_v10 = vsel %vm20_vm0, %v175_v19, 0.0  ;;  %v721_v8 = vsel %vm20_vm0, %v229_v37, 0.0  ;;  %v177_v19 = vld [vmem:[%s2248_s0 + $0x4d0] sm:$0xff] }
  0x5c   :  { %v771_v15 = vadd.f32 %v770_v62, %v769_v46  ;;  %v334_v48 = vadd.f32 %v1316_v51, %v1898_v16  ;;  %v468_v59 = vadd.f32 %v1638_v47, %v466_v54  ;;  %v720_v0 = vadd.f32 %v719_v38, %v718_v12  ;;  %v233_v37 = vld [vmem:[%s2248_s0 + $0x690] sm:$0xff]  ;;  %v234_v46 = vld [vmem:[%s2248_s0 + $0x698] sm:$0xff] }
  0x5d   :  { %v774_v61 = vsel %vm20_vm0, %v253_v2, 0.0  ;;  %v401_v33 = vadd.f32 %v1483_v34, %v399_v60  ;;  %v671_v21 = vadd.f32 %v670_v9, %v669_v22  ;;  %v723_v52 = vsel %vm20_vm0, %v230_v56, 0.0  ;;  %v256_v34 = vld [vmem:[%s2248_s0 + $0x748] sm:$0xff]  ;;  %v257_v62 = vld [vmem:[%s2248_s0 + $0x750] sm:$0xff] }
  0x5e   :  { %v773_v14 = vadd.f32 %v772_v45, %v771_v15  ;;  %v604_v51 = vadd.f32 %v603_v10, %v602_v44  ;;  %v672_v47 = vsel %vm20_vm0, %v207_v29, 0.0  ;;  %v722_v16 = vadd.f32 %v721_v8, %v720_v0  ;;  %v209_v22 = vld [vmem:[%s2248_s0 + $0x5d0] sm:$0xff]  ;;  %v235_v10 = vld [vmem:[%s2248_s0 + $0x6a0] sm:$0xff] }
  0x5f   :  { %v776_v6 = vsel %vm20_vm0, %v254_v23, 0.0  ;;  %v537_v27 = vadd.f32 %v1797_v40, %v535_v31  ;;  %v605_v32 = vsel %vm20_vm0, %v176_v43, 0.0  ;;  %v725_v50 = vsel %vm20_vm0, %v231_v36, 0.0  ;;  %v178_v31 = vld [vmem:[%s2248_s0 + $0x4d8] sm:$0xff]  ;;  %v259_v36 = vld [vmem:[%s2248_s0 + $0x760] sm:$0xff] }
  0x60   :  { %v775_v20 = vadd.f32 %v774_v61, %v773_v14  ;;  %v336_v54 = vadd.f32 %v1330_v57, %v334_v48  ;;  %v470_v26 = vadd.f32 %v1653_v7, %v468_v59  ;;  %v724_v5 = vadd.f32 %v723_v52, %v722_v16  ;;  %v210_v52 = vld [vmem:[%s2248_s0 + $0x5d8] sm:$0xff]  ;;  %v179_v16 = vld [vmem:[%s2248_s0 + $0x4e0] sm:$0xff] }
  0x61   :  { %v778_v40 = vsel %vm20_vm0, %v255_v25, 0.0  ;;  %v403_v2 = vadd.f32 %v1492_v41, %v401_v33  ;;  %v673_v60 = vadd.f32 %v672_v47, %v671_v21  ;;  %v727_v9 = vsel %vm20_vm0, %v232_v39, 0.0  ;;  %v258_v41 = vld [vmem:[%s2248_s0 + $0x758] sm:$0xff]  ;;  %v236_v25 = vld [vmem:[%s2248_s0 + $0x6a8] sm:$0xff] }
  0x62   :  { %v777_v38 = vadd.f32 %v776_v6, %v775_v20  ;;  %v606_v57 = vadd.f32 %v605_v32, %v604_v51  ;;  %v674_v7 = vsel %vm20_vm0, %v208_v35, 0.0  ;;  %v726_v56 = vadd.f32 %v725_v50, %v724_v5  ;;  %v237_v6 = vld [vmem:[%s2248_s0 + $0x6b0] sm:$0xff] }
  0x63   :  { %v780_v44 = vsel %vm20_vm0, %v256_v34, 0.0  ;;  %v539_v12 = vadd.f32 %v1824_v13, %v537_v27  ;;  %v607_v45 = vsel %vm20_vm0, %v177_v19, 0.0  ;;  %v729_v29 = vsel %vm20_vm0, %v233_v37, 0.0 }
  0x64   :  { %v779_v23 = vadd.f32 %v778_v40, %v777_v38  ;;  %v338_v8 = vadd.f32 %v1339_v1, %v336_v54  ;;  %v472_v15 = vadd.f32 %v1665_v24, %v470_v26  ;;  %v728_v43 = vadd.f32 %v727_v9, %v726_v56 }
  0x65   :  { %v782_v13 = vsel %vm20_vm0, %v257_v62, 0.0  ;;  %v405_v48 = vadd.f32 %v1495_v42, %v403_v2  ;;  %v675_v59 = vadd.f32 %v674_v7, %v673_v60  ;;  %v731_v0 = vsel %vm20_vm0, %v234_v46, 0.0  ;;  %v260_v42 = vld [vmem:[%s2248_s0 + $0x768] sm:$0xff]  ;;  %v262_v62 = vld [vmem:[%s2248_s0 + $0x778] sm:$0xff] }
  0x66   :  { %v781_v61 = vadd.f32 %v780_v44, %v779_v23  ;;  %v608_v1 = vadd.f32 %v607_v45, %v606_v57  ;;  %v676_v24 = vsel %vm20_vm0, %v209_v22, 0.0  ;;  %v730_v33 = vadd.f32 %v729_v29, %v728_v43  ;;  %v180_v46 = vld [vmem:[%s2248_s0 + $0x4e8] sm:$0xff]  ;;  %v239_v57 = vld [vmem:[%s2248_s0 + $0x6c0] sm:$0xff] }
  0x67   :  { %v784_v21 = vsel %vm20_vm0, %v258_v41, 0.0  ;;  %v541_v14 = vadd.f32 %v1827_v63, %v539_v12  ;;  %v609_v39 = vsel %vm20_vm0, %v178_v31, 0.0  ;;  %v733_v51 = vsel %vm20_vm0, %v235_v10, 0.0  ;;  %v261_v63 = vld [vmem:[%s2248_s0 + $0x770] sm:$0xff]  ;;  %v263_v22 = vld [vmem:[%s2248_s0 + $0x780] sm:$0xff]  ;;  %v240_v23 = vld [vmem:[%s2248_s0 + $0x6c8] sm:$0xff] }
  0x68   :  { %v783_v47 = vadd.f32 %v782_v13, %v781_v61  ;;  %v474_v35 = vadd.f32 %v1678_v49, %v472_v15  ;;  %v732_v34 = vadd.f32 %v731_v0, %v730_v33  ;;  %v786_v27 = vsel %vm20_vm0, %v259_v36, 0.0  ;;  %v238_v49 = vld [vmem:[%s2248_s0 + $0x6b8] sm:$0xff] }
  0x69   :  { %v407_v32 = vadd.f32 %v1510_v53, %v405_v48  ;;  %v677_v50 = vadd.f32 %v676_v24, %v675_v59  ;;  %v735_v20 = vsel %vm20_vm0, %v236_v25, 0.0  ;;  %v2255_v37 = vmov 0.0   ;;  %v211_v53 = vld [vmem:[%s2248_s0 + $0x5e0] sm:$0xff]  ;;  %v181_v48 = vld [vmem:[%s2248_s0 + $0x4f0] sm:$0xff] }
  0x6a   :  { %v785_v19 = vadd.f32 %v784_v21, %v783_v47  ;;  %954 = vmatprep.mubr.msk.bf16.mxu0 %vm988_vm1, %v2255_v37  ;;  %v610_v54 = vadd.f32 %v609_v39, %v608_v1  ;;  %v678_v26 = vsel %vm20_vm0, %v210_v52, 0.0  ;;  %v734_v5 = vadd.f32 %v733_v51, %v732_v34  ;;  %v241_v59 = vld [vmem:[%s2248_s0 + $0x6d0] sm:$0xff] }
  0x6b   :  { %v788_v40 = vsel %vm20_vm0, %v260_v42, 0.0  ;;  %v543_v2 = vadd.f32 %v1834_v3, %v541_v14  ;;  %v611_v60 = vsel %vm20_vm0, %v179_v16, 0.0  ;;  %v737_v9 = vsel %vm20_vm0, %v237_v6, 0.0  ;;  %v265_v1 = vld [vmem:[%s2248_s0 + $0x790] sm:$0xff]  ;;  %v242_v14 = vld [vmem:[%s2248_s0 + $0x6d8] sm:$0xff] }
  0x6c   :  { %v787_v38 = vadd.f32 %v786_v27, %v785_v19  ;;  %v340_v7 = vadd.f32 %v1355_v11, %v338_v8  ;;  %v476_v56 = vadd.f32 %v1681_v18, %v474_v35  ;;  %v736_v44 = vadd.f32 %v735_v20, %v734_v5  ;;  %v212_v8 = vld [vmem:[%s2248_s0 + $0x5e8] sm:$0xff]  ;;  %v2256_v24 = vld [vmem:[#allocation6_spill] sm:$0xff]  ;;  %v266_v16 = vld [vmem:[%s2248_s0 + $0x798] sm:$0xff] }
  0x6d   :  { %v790_v3 = vsel %vm20_vm0, %v261_v63, 0.0  ;;  %v409_v41 = vadd.f32 %v1516_v58, %v407_v32  ;;  %v679_v12 = vadd.f32 %v678_v26, %v677_v50  ;;  %v739_v45 = vsel %vm20_vm0, %v238_v49, 0.0  ;;  %v264_v58 = vld [vmem:[%s2248_s0 + $0x788] sm:$0xff]  ;;  %v213_v47 = vld [vmem:[%s2248_s0 + $0x5f0] sm:$0xff]  ;;  %v182_v63 = vld [vmem:[%s2248_s0 + $0x4f8] sm:$0xff] }
  0x6e   :  { %v789_v29 = vadd.f32 %v788_v40, %v787_v38  ;;  %v612_v11 = vadd.f32 %v611_v60, %v610_v54  ;;  %v680_v18 = vsel %vm20_vm0, %v211_v53, 0.0  ;;  %v738_v31 = vadd.f32 %v737_v9, %v736_v44  ;;  %v243_v32 = vld [vmem:[%s2248_s0 + $0x6e0] sm:$0xff]  ;;  %v2257_v20 = vld [vmem:[#allocation7_spill] sm:$0xff]  ;;  %v244_v53 = vld [vmem:[%s2248_s0 + $0x6e8] sm:$0xff] }
  0x6f   :  { %v792_v10 = vsel %vm20_vm0, %v262_v62, 0.0  ;;  %v545_v15 = vadd.f32 %v1863_v4, %v543_v2  ;;  %v613_v43 = vsel %vm20_vm0, %v180_v46, 0.0  ;;  %v741_v13 = vsel %vm20_vm0, %v239_v57, 0.0  ;;  %v214_v38 = vld [vmem:[%s2248_s0 + $0x5f8] sm:$0xff]  ;;  %v268_v46 = vld [vmem:[%s2248_s0 + $0x7a8] sm:$0xff] }
  0x70   :  { %v791_v36 = vadd.f32 %v790_v3, %v789_v29  ;;  %v342_v0 = vadd.f32 %v1364_v17, %v340_v7  ;;  %v478_v61 = vadd.f32 %v1693_v28, %v476_v56  ;;  %v740_v25 = vadd.f32 %v739_v45, %v738_v31  ;;  %v245_v3 = vld [vmem:[%s2248_s0 + $0x6f0] sm:$0xff]  ;;  %v246_v31 = vld [vmem:[%s2248_s0 + $0x6f8] sm:$0xff] }
  0x71   :  { %v794_v4 = vsel %vm20_vm0, %v263_v22, 0.0  ;;  %v411_v33 = vadd.f32 %v2256_v24, %v409_v41  ;;  %v681_v21 = vadd.f32 %v680_v18, %v679_v12  ;;  %v743_v52 = vsel %vm20_vm0, %v240_v23, 0.0  ;;  %v269_v29 = vld [vmem:[%s2248_s0 + $0x7b0] sm:$0xff] }
  0x72   :  { %v793_v42 = vadd.f32 %v792_v10, %v791_v36  ;;  %v614_v17 = vadd.f32 %v613_v43, %v612_v11  ;;  %v682_v28 = vsel %vm20_vm0, %v212_v8, 0.0  ;;  %v742_v39 = vadd.f32 %v741_v13, %v740_v25  ;;  %v270_v43 = vld [vmem:[%s2248_s0 + $0x7b8] sm:$0xff] }
  0x73   :  { %v796_v51 = vsel %vm20_vm0, %v264_v58, 0.0  ;;  %v547_v6 = vadd.f32 %v1870_v55, %v545_v15  ;;  %v615_v35 = vsel %vm20_vm0, %v181_v48, 0.0  ;;  %v745_v34 = vsel %vm20_vm0, %v241_v59, 0.0  ;;  %v267_v55 = vld [vmem:[%s2248_s0 + $0x7a0] sm:$0xff] }
  0x74   :  { %v795_v27 = vadd.f32 %v794_v4, %v793_v42  ;;  %v343_v50 = vrot.slane %v342_v0, 4  ;;  %v480_v19 = vadd.f32 %v2257_v20, %v478_v61  ;;  %v744_v37 = vadd.f32 %v743_v52, %v742_v39  ;;  %v271_v4 = vld [vmem:[%s2248_s0 + $0x7c0] sm:$0xff]  ;;  %v274_v20 = vld [vmem:[%s2248_s0 + $0x7d8] sm:$0xff] }
  0x75   :  { %v798_v49 = vsel %vm20_vm0, %v265_v1, 0.0  ;;  %v412_v54 = vrot.slane %v411_v33, 4  ;;  %v683_v26 = vadd.f32 %v682_v28, %v681_v21  ;;  %v747_v5 = vsel %vm20_vm0, %v242_v14, 0.0 }
  0x76   :  { %v797_v40 = vadd.f32 %v796_v51, %v795_v27  ;;  %v616_v62 = vadd.f32 %v615_v35, %v614_v17  ;;  %v684_v2 = vsel %vm20_vm0, %v213_v47, 0.0  ;;  %v746_v60 = vadd.f32 %v745_v34, %v744_v37  ;;  %v272_v17 = vld [vmem:[%s2248_s0 + $0x7c8] sm:$0xff] }
  0x77   :  { %v800_v9 = vsel %vm20_vm0, %v266_v16, 0.0  ;;  %v549_v57 = vadd.f32 %v1901_v30, %v547_v6  ;;  %v617_v7 = vsel %vm20_vm0, %v182_v63, 0.0  ;;  %v749_v56 = vsel %vm20_vm0, %v243_v32, 0.0  ;;  %v273_v6 = vld [vmem:[%s2248_s0 + $0x7d0] sm:$0xff] }
  0x78   :  { %v799_v44 = vadd.f32 %v798_v49, %v797_v40  ;;  %v344_v22 = vadd.f32 %v343_v50, %v342_v0  ;;  %v481_v41 = vrot.slane %v480_v19, 4  ;;  %v748_v12 = vadd.f32 %v747_v5, %v746_v60 }
  0x79   :  { %v802_v45 = vsel %vm20_vm0, %v267_v55, 0.0  ;;  %v413_v23 = vadd.f32 %v412_v54, %v411_v33  ;;  %v685_v30 = vadd.f32 %v684_v2, %v683_v26  ;;  %v751_v11 = vsel %vm20_vm0, %v244_v53, 0.0  ;;  %v275_v26 = vld [vmem:[%s2248_s0 + $0x7e0] sm:$0xff] }
  0x7a   :  { %v801_v18 = vadd.f32 %v800_v9, %v799_v44  ;;  %v618_v10 = vadd.f32 %v617_v7, %v616_v62  ;;  %v686_v8 = vsel %vm20_vm0, %v214_v38, 0.0  ;;  %v750_v58 = vadd.f32 %v749_v56, %v748_v12  ;;  %v276_v9 = vld [vmem:[%s2248_s0 + $0x7e8] sm:$0xff]  ;;  %v277_v44 = vld [vmem:[%s2248_s0 + $0x7f0] sm:$0xff] }
  0x7b   :  { %v804_v15 = vsel %vm20_vm0, %v268_v46, 0.0  ;;  %v550_v13 = vrot.slane %v549_v57, 4  ;;  %v753_v36 = vsel %vm20_vm0, %v245_v3, 0.0  ;;  %v345_v59 = vrot.slane %v344_v22, 2 }
  0x7c   :  { %v803_v48 = vadd.f32 %v802_v45, %v801_v18  ;;  %v482_v0 = vadd.f32 %v481_v41, %v480_v19  ;;  %v752_v61 = vadd.f32 %v751_v11, %v750_v58  ;;  %v806_v25 = vsel %vm20_vm0, %v269_v29, 0.0 }
  0x7d   :  { %v414_v1 = vrot.slane %v413_v23, 2  ;;  %v687_v24 = vadd.f32 %v686_v8, %v685_v30  ;;  %v755_v33 = vsel %vm20_vm0, %v246_v31, 0.0  ;;  %v619_v52 = vrot.slane %v618_v10, 4 }
  0x7e   :  { %v805_v21 = vadd.f32 %v804_v15, %v803_v48  ;;  %v754_v42 = vadd.f32 %v753_v36, %v752_v61  ;;  %v808_v14 = vsel %vm20_vm0, %v270_v43, 0.0  ;;  %v551_v28 = vadd.f32 %v550_v13, %v549_v57 }
  0x7f   :  { %v483_v51 = vrot.slane %v482_v0, 2  ;;  %v810_v16 = vsel %vm20_vm0, %v271_v4, 0.0  ;;  %v346_v35 = vadd.f32 %v345_v59, %v344_v22  ;;  %v415_v34 = vadd.f32 %v414_v1, %v413_v23  ;;  %v278_v23 = vld [vmem:[%s2248_s0 + $0x7f8] sm:$0xff] }
  0x80   :  { %v807_v39 = vadd.f32 %v806_v25, %v805_v21  ;;  %v756_v47 = vadd.f32 %v755_v33, %v754_v42  ;;  %v688_v27 = vrot.slane %v687_v24, 4  ;;  %v620_v32 = vadd.f32 %v619_v52, %v618_v10 }
  0x81   :  { %v812_v50 = vsel %vm20_vm0, %v272_v17, 0.0  ;;  %v552_v19 = vrot.slane %v551_v28, 2  ;;  %v484_v49 = vadd.f32 %v483_v51, %v482_v0  ;;  %v814_v54 = vsel %vm20_vm0, %v273_v6, 0.0 }
  0x82   :  { %v809_v63 = vadd.f32 %v808_v14, %v807_v39  ;;  %v757_v55 = vrot.slane %v756_v47, 4  ;;  %v347_v5 = vrot.slane %v346_v35, 1  ;;  %v416_v40 = vrot.slane %v415_v34, 1 }
  0x83   :  { %v689_v53 = vadd.f32 %v688_v27, %v687_v24  ;;  %v621_v2 = vrot.slane %v620_v32, 2  ;;  %v816_v60 = vsel %vm20_vm0, %v274_v20, 0.0  ;;  %v553_v38 = vadd.f32 %v552_v19, %v551_v28 }
  0x84   :  { %v811_v37 = vadd.f32 %v810_v16, %v809_v63  ;;  %v485_v57 = vrot.slane %v484_v49, 1  ;;  %v758_v7 = vadd.f32 %v757_v55, %v756_v47  ;;  %v818_v56 = vsel %vm20_vm0, %v275_v26, 0.0  ;;  %v22_v16 = vld [vmem:[#allocation2] sm:$0xff] }
  0x85   :  { %v348_v3 = vadd.f32 %v347_v5, %v346_v35  ;;  %v417_v22 = vadd.f32 %v416_v40, %v415_v34  ;;  %v690_v41 = vrot.slane %v689_v53, 2  ;;  %v622_v45 = vadd.f32 %v621_v2, %v620_v32  ;;  %v943_v32 = vld [vmem:[%s2250_s2] ss:$0 sm:$0xff] }
  0x86   :  { %v813_v62 = vadd.f32 %v812_v50, %v811_v37  ;;  %v820_v29 = vsel %vm20_vm0, %v276_v9, 0.0  ;;  %v554_v30 = vrot.slane %v553_v38, 1  ;;  %v486_v18 = vadd.f32 %v485_v57, %v484_v49 }
  0x87   :  { %v759_v31 = vrot.slane %v758_v7, 2  ;;  %v822_v10 = vsel %vm20_vm0, %v277_v44, 0.0  ;;  %v691_v8 = vadd.f32 %v690_v41, %v689_v53  ;;  %v841_v15 = vsel %vm840_vm2, %v417_v22, %v348_v3 }
  0x88   :  { %v815_v46 = vadd.f32 %v814_v54, %v813_v62  ;;  %v623_v43 = vrot.slane %v622_v45, 1  ;;  %v824_v13 = vsel %vm20_vm0, %v278_v23, 0.0  ;;  %v555_v36 = vadd.f32 %v554_v30, %v553_v38 }
  0x89   :  { %v760_v59 = vadd.f32 %v759_v31, %v758_v7  ;;  %v843_v0 = vsel %vm842_vm3, %v486_v18, %v841_v15  ;;  %v692_v61 = vrot.slane %v691_v8, 1  ;;  %vm846_vm5 = vcmask 1044484  }
  0x8a   :  { %v817_v12 = vadd.f32 %v816_v60, %v815_v46  ;;  %v624_v4 = vadd.f32 %v623_v43, %v622_v45  ;;  %v845_v24 = vsel %vm844_vm4, %v555_v36, %v843_v0  ;;  %vm848_vm6 = vcmask 1045509  }
  0x8b   :  { %v761_v33 = vrot.slane %v760_v59, 1  ;;  %v693_v21 = vadd.f32 %v692_v61, %v691_v8  ;;  %vm850_vm7 = vcmask 1046534   ;;  %vm852_vm8 = vcmask 1047559  }
  0x8c   :  { %v819_v11 = vadd.f32 %v818_v56, %v817_v12  ;;  %v847_v42 = vsel %vm846_vm5, %v624_v4, %v845_v24 }
  0x8d   :  { %v762_v17 = vadd.f32 %v761_v33, %v760_v59  ;;  %v849_v39 = vsel %vm848_vm6, %v693_v21, %v847_v42 }
  0x8e   :  { %v821_v58 = vadd.f32 %v820_v29, %v819_v11 }
  0x8f   :  { %v851_v47 = vsel %vm850_vm7, %v762_v17, %v849_v39 }
  0x90   :  { %v823_v48 = vadd.f32 %v822_v10, %v821_v58 }
  0x92   :  { %v825_v25 = vadd.f32 %v824_v13, %v823_v48 }
  0x94   :  { %v826_v1 = vrot.slane %v825_v25, 4 }
  0x96   :  { %v827_v52 = vadd.f32 %v826_v1, %v825_v25 }
  0x98   :  { %v828_v14 = vrot.slane %v827_v52, 2 }
  0x9a   :  { %v829_v28 = vadd.f32 %v828_v14, %v827_v52 }
  0x9c   :  { %v830_v51 = vrot.slane %v829_v28, 1 }
  0x9e   :  { %v831_v6 = vadd.f32 %v830_v51, %v829_v28 }
  0xa0   :  { %v853_v35 = vsel %vm852_vm8, %v831_v6, %v851_v47 }
  0xa1   :  { %v855_v34 = vadd.f32 %v853_v35, %v22_v16 }
  0xa3   :  { %856 = vst.msk [vmem:[#allocation2] sm:$0xff] %vm20_vm0, %v855_v34 }
  0xaa   :  { %v860_v27 = vld [vmem:[#allocation2] sm:$0xff] }
  0xab   :  { %v861_v63 = vpack.c.bf16 %v860_v27, %v860_v27 }
  0xad   :  { %955 = vmatmul.mubr.msk.bf16.vlgmr.msra.gmra.mrb[0].mxu0 %vm20_vm0, %v861_v63 }
 0x180   :  { %v922_v50 = vpop.f32.mrb[0].mxu0 }
 0x181   :  { %v956_v20 = vpop.f32.mrb[1].mxu0  ;;  %v923_v19 = vadd.f32 %v943_v32, %v922_v50 }
 0x182   :  { %v925_v37 = vpop.f32.mrb[2].mxu0 }
 0x183   :  { %928 = vst [vmem:[#allocation3] sm:$0xff] %v923_v19  ;;  %v957_v49 = vpop.f32.mrb[3].mxu0 }
 0x184   :  { %974 = shalt.err (!%p971_p4)
}
 0x185   :  { %s975_s2 = scalar_lea.hbm %s2251_s3, 128 }
 0x186   :  { %p976_p5 = scmp.ne.s32.totalorder %s2251_s3, %s975_s2  ;;  %p979_p6 = scmp.lt.u32.totalorder %s975_s2, %s2251_s3 }
 0x188   :  { %p981_p7 = pnand %p979_p6, %p976_p5 }
 0x18a   :  { %984 = shalt.err (!%p981_p7)
}
 0x18b   :  { %938 = dma.vmem_to_hbm [thread:$0]  %s936_s9, 128, %s2251_s3, [#allocation4]  }
 0x18c   :  { %985 = dma.done.wait [#allocation4], 128  }
 0x18d   :  { %986 = vsyncadd [#allocation4], 4294967168 }
 0x18e   :  { %942 = vsyncpa [#allocation4], 1 }

</bundles_post_ra>
